<compile_context>
chip_gen: v7x
topology: tpu7x:2x2x1
jax: 0.10.0
libtpu: 0.0.40
codegen_flags: <defaults>
</compile_context>

<pallas_src>
import math

import jax
import jax.numpy as jnp
from jax.experimental import pallas as pl
from jax.experimental.pallas import tpu as pltpu


def _round_up(x, m):
    return ((x + m - 1) // m) * m


def _pick_tk(d_pad, tk_request):
    """Largest multiple of 128 that divides d_pad and is <= tk_request."""
    tk_request = max(128, (tk_request // 128) * 128)
    best = 128
    t = 128
    limit = min(tk_request, d_pad)
    while t <= limit:
        if d_pad % t == 0:
            best = t
        t += 128
    return best


def _maybe_pad2(a, rows, cols):
    pr = rows - a.shape[0]
    pc = cols - a.shape[1]
    if pr or pc:
        a = jnp.pad(a, ((0, pr), (0, pc)))
    return a


def _score_kernel(x1_ref, x2_ref, w1_ref, w2_ref, b_ref, wo_ref, out_ref, acc_ref):
    k = pl.program_id(1)

    @pl.when(k == 0)
    def _():
        acc_ref[...] = jnp.zeros_like(acc_ref)

    # Per-tile bf16 cast of the f32 activation stream (f32 accumulation on the
    # MXU).  The cast is VALU work hidden under the MXU/DMA bottleneck and
    # replaces a wrapper-side full pass over the activations.
    x1 = x1_ref[...].astype(jnp.bfloat16)
    x2 = x2_ref[...].astype(jnp.bfloat16)
    acc_ref[...] += jnp.dot(x1, w1_ref[...], preferred_element_type=jnp.float32)
    acc_ref[...] += jnp.dot(x2, w2_ref[...], preferred_element_type=jnp.float32)

    # Finalize once per M tile: bias + ReLU + (HID -> 1) VPU/XLU reduction.
    @pl.when(k == pl.num_programs(1) - 1)
    def _():
        h = jnp.maximum(acc_ref[...] + b_ref[...], 0.0)
        out_ref[...] = jnp.sum(h * wo_ref[...], axis=-1, keepdims=True)


def get_score(masked_input, img2, w1, w2, b, wo, *, tm=None, tk=2048):
    """masked_input, img2: (N, C, H, W).  Returns (N, 1) float32.

    tm: M (batch/mask) tile.  Defaults to min(256, round_up(N, 8)).  For a
        real Score-CAM mask batch keep tm >= 256 so W1/W2 are re-streamed at
        most (1 + HID/tm)x the minimum; for v7x keep gm = N_pad/tm >= 2 so the
        "parallel" m axis feeds both TensorCores.
    tk: reduction (D) tile request; snapped to the largest 128-multiple that
        divides the 128-padded D (so no extra activation padding is created).
        2048 fits comfortably in default scoped VMEM on v5e/v6e/v7x; larger
        values automatically raise vmem_limit_bytes.
    """
    n = masked_input.shape[0]
    d = math.prod(masked_input.shape[1:])
    hid = w1.shape[1]

    x1 = masked_input.reshape(n, d).astype(jnp.float32)
    x2 = img2.reshape(n, d).astype(jnp.float32)

    # --- tiling / padding -------------------------------------------------
    d_pad = _round_up(d, 128)
    tk = _pick_tk(d_pad, tk)

    if tm is None:
        tm = min(256, _round_up(n, 8))      # 8: f32 sublane tile
    n_pad = _round_up(n, tm)

    # Activations stay f32 (cast per-tile inside the kernel); padding only if
    # the shapes actually need it.
    x1p = _maybe_pad2(x1, n_pad, d_pad)
    x2p = _maybe_pad2(x2, n_pad, d_pad)
    # Weights: pad + bf16 cast once (constant across Score-CAM iterations).
    w1p = _maybe_pad2(w1.astype(jnp.float32), d_pad, hid).astype(jnp.bfloat16)
    w2p = _maybe_pad2(w2.astype(jnp.float32), d_pad, hid).astype(jnp.bfloat16)
    b2 = b.reshape(1, hid).astype(jnp.float32)
    wo2 = wo.reshape(1, hid).astype(jnp.float32)

    gm = n_pad // tm
    gk = d_pad // tk

    # Honest HBM traffic estimate: f32 activations streamed once, bf16
    # weights re-streamed once per M tile under this grid order.
    bytes_accessed = ((x1p.size + x2p.size) * 4
                      + gm * (w1p.size + w2p.size) * 2
                      + (b2.size + wo2.size) * 4
                      + n_pad * 4)
    cost = pl.CostEstimate(
        flops=2 * 2 * n_pad * d_pad * hid + 3 * n_pad * hid,
        transcendentals=0,
        bytes_accessed=bytes_accessed)

    # VMEM budget (double-buffered inputs + resident accumulator); raise the
    # scoped limit only when a caller asks for tiles beyond the defaults.
    vmem_need = (2 * 2 * tm * tk * 4        # x1/x2, f32, double-buffered
                 + 2 * 2 * tk * hid * 2     # W1/W2, bf16, double-buffered
                 + tm * hid * 4             # accumulator
                 + 2 * tm * 4               # output, double-buffered
                 + 2 * 2 * hid * 4)         # bias / w_out
    vmem_limit = None
    if vmem_need > 30 * 1024 * 1024:
        vmem_limit = min(int(vmem_need * 1.25) + (1 << 20), 60 * 1024 * 1024)

    out = pl.pallas_call(
        _score_kernel,
        out_shape=jax.ShapeDtypeStruct((n_pad, 1), jnp.float32),
        grid=(gm, gk),
        in_specs=[
            pl.BlockSpec((tm, tk), lambda m, k: (m, k)),    # x1 tile (f32)
            pl.BlockSpec((tm, tk), lambda m, k: (m, k)),    # x2 tile (f32)
            pl.BlockSpec((tk, hid), lambda m, k: (k, 0)),   # W1 tile (bf16)
            pl.BlockSpec((tk, hid), lambda m, k: (k, 0)),   # W2 tile (bf16)
            pl.BlockSpec((1, hid), lambda m, k: (0, 0)),    # bias (f32)
            pl.BlockSpec((1, hid), lambda m, k: (0, 0)),    # w_out row (f32)
        ],
        out_specs=pl.BlockSpec((tm, 1), lambda m, k: (m, 0)),
        scratch_shapes=[pltpu.VMEM((tm, hid), jnp.float32)],
        compiler_params=pltpu.CompilerParams(
            dimension_semantics=("parallel", "arbitrary"),
            vmem_limit_bytes=vmem_limit),
        cost_estimate=cost,
    )(x1p, x2p, w1p, w2p, b2, wo2)

    return out[:n]


def get_score_ref(masked_input, img2, w1, w2, b, wo, *, cast_bf16=True):
    """Pure-JAX reference.  cast_bf16=True matches the kernel's operand
    precision (bf16 MXU operands, f32 accumulation)."""
    n = masked_input.shape[0]
    x1 = masked_input.reshape(n, -1)
    x2 = img2.reshape(n, -1)
    if cast_bf16:
        x1 = x1.astype(jnp.bfloat16)
        x2 = x2.astype(jnp.bfloat16)
        w1 = w1.astype(jnp.bfloat16)
        w2 = w2.astype(jnp.bfloat16)
    h = jnp.maximum(
        jnp.dot(x1, w1, preferred_element_type=jnp.float32)
        + jnp.dot(x2, w2, preferred_element_type=jnp.float32)
        + b.astype(jnp.float32),
        0.0)
    return jnp.dot(h, wo.astype(jnp.float32))


if __name__ == "__main__":
    N, C, H, W = 2, 4, 16, 16
    D = C * H * W          # 1024
    HID = 128

    key = jax.random.PRNGKey(0)
    k1, k2, k3, k4, k5, k6 = jax.random.split(key, 6)

    masked_input = jax.random.normal(k1, (N, C, H, W), dtype=jnp.float32)
    img2 = jax.random.normal(k2, (N, C, H, W), dtype=jnp.float32)

    # Deterministic synthetic parameters for the wrapped scoring model.
    w1 = jax.random.normal(k3, (D, HID), dtype=jnp.float32) * (1.0 / D**0.5)
    w2 = jax.random.normal(k4, (D, HID), dtype=jnp.float32) * (1.0 / D**0.5)
    b = jax.random.normal(k5, (1, HID), dtype=jnp.float32) * 0.01
    wo = jax.random.normal(k6, (HID, 1), dtype=jnp.float32) * (1.0 / HID**0.5)

    # Default config: tk snaps to 1024 (divides D) -> single K step.
    out = get_score(masked_input, img2, w1, w2, b, wo)
    out = jax.block_until_ready(out)
    assert out.shape == (N, 1)

    # Precision-matched reference (bf16 operands, f32 accumulation): tight tol.
    ref_bf16 = get_score_ref(masked_input, img2, w1, w2, b, wo, cast_bf16=True)
    assert jnp.allclose(out, ref_bf16, atol=1e-3, rtol=1e-3), (out, ref_bf16)

    # Sanity check against the pure-f32 (PyTorch-semantics) reference.
    ref_f32 = get_score_ref(masked_input, img2, w1, w2, b, wo, cast_bf16=False)
    assert jnp.allclose(out, ref_f32, atol=5e-2, rtol=5e-2), (out, ref_f32)

    # Multi-step reduction path (tk=256 -> gk=4) to validate the accumulator
    # init/finalize logic across K grid steps.
    out_multi = get_score(masked_input, img2, w1, w2, b, wo, tk=256)
    out_multi = jax.block_until_ready(out_multi)
    assert jnp.allclose(out_multi, ref_bf16, atol=1e-3, rtol=1e-3), (out_multi, ref_bf16)

    print("KERNEL_OK")
</pallas_src>

<mosaic_0001>
module attributes {stable_mosaic.version = 11 : i64} {
  func.func @_score_kernel(%arg0: i32, %arg1: i32, %arg2: memref<8x1024xf32, #tpu.memory_space<vmem>>, %arg3: memref<8x1024xf32, #tpu.memory_space<vmem>>, %arg4: memref<1024x128xbf16, #tpu.memory_space<vmem>>, %arg5: memref<1024x128xbf16, #tpu.memory_space<vmem>>, %arg6: memref<1x128xf32, #tpu.memory_space<vmem>>, %arg7: memref<1x128xf32, #tpu.memory_space<vmem>>, %arg8: memref<8x1xf32, #tpu.memory_space<vmem>>, %arg9: memref<8x128xf32, #tpu.memory_space<vmem>>) attributes {dimension_semantics = [#tpu.dimension_semantics<parallel>, #tpu.dimension_semantics<arbitrary>], iteration_bounds = array<i64: 1, 1>, scalar_prefetch = 0 : i64, scratch_operands = 1 : i64, tpu.core_type = #tpu.core_type<tc>, window_params = [{transform_indices = @transform_0, window_bounds = array<i64: 8, 1024>}, {transform_indices = @transform_1, window_bounds = array<i64: 8, 1024>}, {transform_indices = @transform_2, window_bounds = array<i64: 1024, 128>}, {transform_indices = @transform_3, window_bounds = array<i64: 1024, 128>}, {pipeline_mode = #tpu.pipeline_mode<synchronous>, transform_indices = @transform_4, window_bounds = array<i64: 1, 128>}, {pipeline_mode = #tpu.pipeline_mode<synchronous>, transform_indices = @transform_5, window_bounds = array<i64: 1, 128>}, {transform_indices = @transform_6, window_bounds = array<i64: 8, 1>}]} {
    %c0_i32 = arith.constant 0 : i32
    %0 = arith.cmpi eq, %arg1, %c0_i32 : i32
    %1 = arith.extui %0 : i1 to i32
    %c0_i32_0 = arith.constant 0 : i32
    %2 = arith.cmpi ne, %1, %c0_i32_0 : i32
    scf.if %2 {
      %cst_19 = arith.constant 0.000000e+00 : f32
      %20 = vector.broadcast %cst_19 : f32 to vector<8x128xf32>
      %c0_20 = arith.constant 0 : index
      %c0_21 = arith.constant 0 : index
      %21 = vector.load %arg9[%c0_20, %c0_21] : memref<8x128xf32, #tpu.memory_space<vmem>>, vector<8x128xf32>
      tpu.vector_store %arg9[%c0_20, %c0_21], %20 {strides = array<i32>} : memref<8x128xf32, #tpu.memory_space<vmem>>, vector<8x128xf32>,
    } else {
    }
    %c0 = arith.constant 0 : index
    %c0_1 = arith.constant 0 : index
    %3 = vector.load %arg2[%c0, %c0_1] : memref<8x1024xf32, #tpu.memory_space<vmem>>, vector<8x1024xf32>
    %4 = arith.truncf %3 : vector<8x1024xf32> to vector<8x1024xbf16>
    %c0_2 = arith.constant 0 : index
    %c0_3 = arith.constant 0 : index
    %5 = vector.load %arg3[%c0_2, %c0_3] : memref<8x1024xf32, #tpu.memory_space<vmem>>, vector<8x1024xf32>
    %6 = arith.truncf %5 : vector<8x1024xf32> to vector<8x1024xbf16>
    %c0_4 = arith.constant 0 : index
    %c0_5 = arith.constant 0 : index
    %7 = vector.load %arg9[%c0_4, %c0_5] : memref<8x128xf32, #tpu.memory_space<vmem>>, vector<8x128xf32>
    %c0_6 = arith.constant 0 : index
    %c0_7 = arith.constant 0 : index
    %8 = vector.load %arg4[%c0_6, %c0_7] : memref<1024x128xbf16, #tpu.memory_space<vmem>>, vector<1024x128xbf16>
    %cst = arith.constant dense<0.000000e+00> : vector<8x128xf32>
    %9 = tpu.matmul %4, %8, %cst {dimension_numbers = #tpu.dot_dimension_numbers<[1], [0], [0], [1], [0, 0, 1, 1], [], []>} : vector<8x1024xbf16>, vector<1024x128xbf16>, vector<8x128xf32> -> vector<8x128xf32>
    %10 = arith.addf %7, %9 : vector<8x128xf32>
    %c0_8 = arith.constant 0 : index
    %c0_9 = arith.constant 0 : index
    %11 = vector.load %arg9[%c0_8, %c0_9] : memref<8x128xf32, #tpu.memory_space<vmem>>, vector<8x128xf32>
    tpu.vector_store %arg9[%c0_8, %c0_9], %10 {strides = array<i32>} : memref<8x128xf32, #tpu.memory_space<vmem>>, vector<8x128xf32>,
    %c0_10 = arith.constant 0 : index
    %c0_11 = arith.constant 0 : index
    %12 = vector.load %arg9[%c0_10, %c0_11] : memref<8x128xf32, #tpu.memory_space<vmem>>, vector<8x128xf32>
    %c0_12 = arith.constant 0 : index
    %c0_13 = arith.constant 0 : index
    %13 = vector.load %arg5[%c0_12, %c0_13] : memref<1024x128xbf16, #tpu.memory_space<vmem>>, vector<1024x128xbf16>
    %cst_14 = arith.constant dense<0.000000e+00> : vector<8x128xf32>
    %14 = tpu.matmul %6, %13, %cst_14 {dimension_numbers = #tpu.dot_dimension_numbers<[1], [0], [0], [1], [0, 0, 1, 1], [], []>} : vector<8x1024xbf16>, vector<1024x128xbf16>, vector<8x128xf32> -> vector<8x128xf32>
    %15 = arith.addf %12, %14 : vector<8x128xf32>
    %c0_15 = arith.constant 0 : index
    %c0_16 = arith.constant 0 : index
    %16 = vector.load %arg9[%c0_15, %c0_16] : memref<8x128xf32, #tpu.memory_space<vmem>>, vector<8x128xf32>
    tpu.vector_store %arg9[%c0_15, %c0_16], %15 {strides = array<i32>} : memref<8x128xf32, #tpu.memory_space<vmem>>, vector<8x128xf32>,
    %c0_i32_17 = arith.constant 0 : i32
    %17 = arith.cmpi eq, %arg1, %c0_i32_17 : i32
    %18 = arith.extui %17 : i1 to i32
    %c0_i32_18 = arith.constant 0 : i32
    %19 = arith.cmpi ne, %18, %c0_i32_18 : i32
    scf.if %19 {
      %c0_19 = arith.constant 0 : index
      %c0_20 = arith.constant 0 : index
      %20 = vector.load %arg9[%c0_19, %c0_20] : memref<8x128xf32, #tpu.memory_space<vmem>>, vector<8x128xf32>
      %c0_21 = arith.constant 0 : index
      %c0_22 = arith.constant 0 : index
      %21 = vector.load %arg6[%c0_21, %c0_22] : memref<1x128xf32, #tpu.memory_space<vmem>>, vector<1x128xf32>
      %22 = vector.broadcast %21 : vector<1x128xf32> to vector<8x128xf32>
      %23 = arith.addf %20, %22 : vector<8x128xf32>
      %cst_23 = arith.constant 0.000000e+00 : f32
      %24 = vector.broadcast %cst_23 : f32 to vector<8x128xf32>
      %25 = arith.maximumf %23, %24 : vector<8x128xf32>
      %c0_24 = arith.constant 0 : index
      %c0_25 = arith.constant 0 : index
      %26 = vector.load %arg7[%c0_24, %c0_25] : memref<1x128xf32, #tpu.memory_space<vmem>>, vector<1x128xf32>
      %27 = vector.broadcast %26 : vector<1x128xf32> to vector<8x128xf32>
      %28 = arith.mulf %25, %27 : vector<8x128xf32>
      %cst_26 = arith.constant dense<0.000000e+00> : vector<8xf32>
      %29 = vector.multi_reduction <add>, %28, %cst_26 [1] : vector<8x128xf32> to vector<8xf32>
      %30 = vector.shape_cast %29 : vector<8xf32> to vector<8x1xf32>
      %c0_27 = arith.constant 0 : index
      %c0_28 = arith.constant 0 : index
      %31 = vector.load %arg8[%c0_27, %c0_28] : memref<8x1xf32, #tpu.memory_space<vmem>>, vector<8x1xf32>
      tpu.vector_store %arg8[%c0_27, %c0_28], %30 {strides = array<i32>} : memref<8x1xf32, #tpu.memory_space<vmem>>, vector<8x1xf32>,
    } else {
    }
    return
  }
  func.func @transform_0(%arg0: i32, %arg1: i32) -> (i32, i32) {
    %c0_i32 = arith.constant 0 : i32
    return %arg0, %arg1 : i32, i32
  }
  func.func @transform_1(%arg0: i32, %arg1: i32) -> (i32, i32) {
    %c0_i32 = arith.constant 0 : i32
    return %arg0, %arg1 : i32, i32
  }
  func.func @transform_2(%arg0: i32, %arg1: i32) -> (i32, i32) {
    %c0_i32 = arith.constant 0 : i32
    %c0_i32_0 = arith.constant 0 : i32
    return %arg1, %c0_i32 : i32, i32
  }
  func.func @transform_3(%arg0: i32, %arg1: i32) -> (i32, i32) {
    %c0_i32 = arith.constant 0 : i32
    %c0_i32_0 = arith.constant 0 : i32
    return %arg1, %c0_i32 : i32, i32
  }
  func.func @transform_4(%arg0: i32, %arg1: i32) -> (i32, i32) {
    %c0_i32 = arith.constant 0 : i32
    %c0_i32_0 = arith.constant 0 : i32
    %c0_i32_1 = arith.constant 0 : i32
    return %c0_i32, %c0_i32_0 : i32, i32
  }
  func.func @transform_5(%arg0: i32, %arg1: i32) -> (i32, i32) {
    %c0_i32 = arith.constant 0 : i32
    %c0_i32_0 = arith.constant 0 : i32
    %c0_i32_1 = arith.constant 0 : i32
    return %c0_i32, %c0_i32_0 : i32, i32
  }
  func.func @transform_6(%arg0: i32, %arg1: i32) -> (i32, i32) {
    %c0_i32 = arith.constant 0 : i32
    %c0_i32_0 = arith.constant 0 : i32
    return %arg0, %c0_i32 : i32, i32
  }
}

</mosaic_0001>

<bundles_post_ra>
// kernel: tpu_custom_call.1
= control target key start
LH: loop header
LB: loop body
LE: loop exit
PB: predicated region body
PF: predicated region fallthrough
CT: control target
= control target key end

     0   :  { %11 = vsyncpa [#allocation4], 0  ;;  %s2126_s0 = inlined_call_operand.hbm [shape: f32[8,1024], index: 0, kind: input, shape index: {}]   ;;  %s2127_s1 = inlined_call_operand.hbm [shape: f32[8,1024], index: 1, kind: input, shape index: {}]   ;;  %s2128_s2 = inlined_call_operand.hbm [shape: bf16[1024,128], index: 2, kind: input, shape index: {}]   ;;  %s2129_s3 = inlined_call_operand.hbm [shape: bf16[1024,128], index: 3, kind: input, shape index: {}]   ;;  %s2130_s4 = inlined_call_operand.vmem [shape: f32[1,128], index: 4, kind: input, shape index: {}]   ;;  %s2131_s5 = inlined_call_operand.vmem [shape: f32[1,128], index: 5, kind: input, shape index: {}]   ;;  %s2132_s6 = inlined_call_operand.vmem [shape: f32[8,1], index: 6, kind: output, shape index: {}]  }
   0x1   :  { %12 = vsyncpa [#allocation6], 0 }
   0x2   :  { %13 = vsyncpa [#allocation9], 0  ;;  %s2028_s21 = smov [#allocation5]   ;;  %s2029_s23 = smov [#allocation3]  }
   0x3   :  { %s30_s22 = sshll.u32 %s2028_s21, 4  ;;  %s20_s24 = sshll.u32 %s2029_s23, 4  ;;  %s31_s22 = int_to_ptr.vmem [resolvable:$true] %s30_s22  ;;  %s21_s24 = int_to_ptr.vmem [resolvable:$true] %s20_s24 }
   0x4   :  { %s1934_s27 = scalar_lea.hbm %s2127_s1, 1024 }
   0x5   :  { %p1935_p0 = scmp.ne.s32.totalorder %s2127_s1, %s1934_s27  ;;  %p1938_p1 = scmp.lt.u32.totalorder %s1934_s27, %s2127_s1 }
   0x7   :  { %p1940_p2 = pnand %p1938_p1, %p1935_p0 }
   0x9   :  { %1943 = shalt.err (!%p1940_p2)
}
   0xa   :  { %s1944_s8 = scalar_lea.vmem %s31_s22, 1024  ;;  %p1949_p4 = scmp.lt.s32.totalorder %s31_s22, %s31_s22 }
   0xb   :  { %p1945_p3 = scmp.ne.s32.totalorder %s31_s22, %s1944_s8  ;;  %p1950_p5 = scmp.lt.s32.totalorder %s1944_s8, %s1944_s8 }
   0xd   :  { %p1951_p6 = por %p1950_p5, %p1949_p4 }
   0xf   :  { %p1952_p7 = pnand %p1951_p6, %p1945_p3 }
  0x11   :  { %1955 = shalt.err (!%p1952_p7)
}
  0x12   :  { %33 = dma.hbm_to_vmem [thread:$0]  %s2127_s1, 1024, %s31_s22, [#allocation6]  }
  0x13   :  { %s1956_s13 = scalar_lea.hbm %s2126_s0, 1024 }
  0x14   :  { %p1957_p8 = scmp.ne.s32.totalorder %s2126_s0, %s1956_s13  ;;  %p1960_p9 = scmp.lt.u32.totalorder %s1956_s13, %s2126_s0 }
  0x16   :  { %p1962_p10 = pnand %p1960_p9, %p1957_p8 }
  0x18   :  { %1965 = shalt.err (!%p1962_p10)
}
  0x19   :  { %s1966_s18 = scalar_lea.vmem %s21_s24, 1024  ;;  %p1971_p12 = scmp.lt.s32.totalorder %s21_s24, %s21_s24 }
  0x1a   :  { %p1967_p11 = scmp.ne.s32.totalorder %s21_s24, %s1966_s18  ;;  %p1972_p13 = scmp.lt.s32.totalorder %s1966_s18, %s1966_s18 }
  0x1c   :  { %p1973_p0 = por %p1972_p13, %p1971_p12 }
  0x1e   :  { %p1974_p1 = pnand %p1973_p0, %p1967_p11 }
  0x20   :  { %1977 = shalt.err (!%p1974_p1)
}
  0x21   :  { %23 = dma.hbm_to_vmem [thread:$0]  %s2126_s0, 1024, %s21_s24, [#allocation4]  }
  0x22   :  { %s2030_s20 = smov [#allocation7]   ;;  %s1978_s25 = scalar_lea.hbm %s2128_s2, 8192 }
  0x23   :  { %s39_s21 = sshll.u32 %s2030_s20, 4  ;;  %p1979_p2 = scmp.ne.s32.totalorder %s2128_s2, %s1978_s25  ;;  %s40_s21 = int_to_ptr.vmem [resolvable:$true] %s39_s21 }
  0x24   :  { %p1982_p3 = scmp.lt.u32.totalorder %s1978_s25, %s2128_s2 }
  0x26   :  { %p1984_p4 = pnand %p1982_p3, %p1979_p2 }
  0x28   :  { %1987 = shalt.err (!%p1984_p4)
}
  0x29   :  { %s1988_s30 = scalar_lea.vmem %s40_s21, 8192  ;;  %p1993_p6 = scmp.lt.s32.totalorder %s40_s21, %s40_s21 }
  0x2a   :  { %p1989_p5 = scmp.ne.s32.totalorder %s40_s21, %s1988_s30  ;;  %p1994_p7 = scmp.lt.s32.totalorder %s1988_s30, %s1988_s30 }
  0x2c   :  { %p1995_p8 = por %p1994_p7, %p1993_p6 }
  0x2e   :  { %p1996_p9 = pnand %p1995_p8, %p1989_p5 }
  0x30   :  { %1999 = shalt.err (!%p1996_p9)
}
  0x31   :  { %s2031_s0 = smov 64   ;;  %s2032_s24 = smov 4  }
  0x32   :  { %45 = dma.hbm_to_vmem [thread:$0]  %s2128_s2, 8192, %s40_s21, [#allocation6], %s2031_s0, %s2031_s0, %s2032_s24  }
  0x33   :  { %s2033_s9 = smov [#allocation8]   ;;  %s2000_s13 = scalar_lea.hbm %s2129_s3, 8192 }
  0x34   :  { %s51_s10 = sshll.u32 %s2033_s9, 4  ;;  %p2001_p10 = scmp.ne.s32.totalorder %s2129_s3, %s2000_s13  ;;  %s52_s10 = int_to_ptr.vmem [resolvable:$true] %s51_s10 }
  0x35   :  { %p2004_p11 = scmp.lt.u32.totalorder %s2000_s13, %s2129_s3 }
  0x37   :  { %p2006_p12 = pnand %p2004_p11, %p2001_p10 }
  0x39   :  { %2009 = shalt.err (!%p2006_p12)
}
  0x3a   :  { %s2010_s18 = scalar_lea.vmem %s52_s10, 8192  ;;  %p2015_p0 = scmp.lt.s32.totalorder %s52_s10, %s52_s10 }
  0x3b   :  { %p2011_p13 = scmp.ne.s32.totalorder %s52_s10, %s2010_s18  ;;  %p2016_p1 = scmp.lt.s32.totalorder %s2010_s18, %s2010_s18 }
  0x3d   :  { %p2017_p2 = por %p2016_p1, %p2015_p0 }
  0x3f   :  { %p2018_p3 = pnand %p2017_p2, %p2011_p13 }
  0x41   :  { %2021 = shalt.err (!%p2018_p3)
}
  0x42   :  { %57 = dma.hbm_to_vmem [thread:$0]  %s2129_s3, 8192, %s52_s10, [#allocation9], %s2031_s0, %s2031_s0, %s2032_s24  }
  0x43   :  { %2022 = dma.done.wait [#allocation4], 1024  }
  0x44   :  { %2023 = vsyncadd [#allocation4], 4294966272 }
  0x45   :  { %2024 = dma.done.wait [#allocation6], 9216  }
  0x46   :  { %2025 = vsyncadd [#allocation6], 4294958080 }
  0x47   :  { %2026 = dma.done.wait [#allocation9], 8192  }
  0x48   :  { %2027 = vsyncadd [#allocation9], 4294959104  ;;  %v1806_v0 = vld [vmem:[#allocation7 + $0x40] sm:$0xff]   ;;  %v1810_v4 = vld [vmem:[#allocation7 + $0x48] sm:$0xff]   ;;  %vm1485_vm0 = vcmask 7168  }
  0x49   :  { %v1807_v1 = vld [vmem:[#allocation7 + $0xc0] sm:$0xff]   ;;  %1624 = vmatprep.subr.bf16.mxu0 %v1806_v0  ;;  %v1811_v5 = vld [vmem:[#allocation7 + $0xc8] sm:$0xff]   ;;  %v1814_v8 = vld [vmem:[#allocation7 + $0x50] sm:$0xff]  }
  0x4a   :  { %v1808_v2 = vld [vmem:[#allocation7] sm:$0xff]   ;;  %1646 = vmatprep.subr.bf16.mxu1 %v1807_v1  ;;  %v1812_v6 = vld [vmem:[#allocation7 + $0x8] sm:$0xff]   ;;  %v1815_v9 = vld [vmem:[#allocation7 + $0xd0] sm:$0xff]  }
  0x4b   :  { %v1809_v3 = vld [vmem:[#allocation7 + $0x80] sm:$0xff]   ;;  %1625 = vmatpush3.bf16.msra.mxu0 %v1808_v2  ;;  %v1813_v7 = vld [vmem:[#allocation7 + $0x88] sm:$0xff]   ;;  %v1816_v10 = vld [vmem:[#allocation7 + $0x10] sm:$0xff]  }
  0x4c   :  { %1647 = vmatpush3.bf16.msra.mxu1 %v1809_v3  ;;  %1626 = vmatprep.subr.bf16.mxu0 %v1810_v4  ;;  %v1817_v11 = vld [vmem:[#allocation7 + $0x90] sm:$0xff]   ;;  %v1818_v12 = vld [vmem:[#allocation7 + $0x58] sm:$0xff]   ;;  %v1822_v16 = vld [vmem:[#allocation7 + $0x60] sm:$0xff]  }
  0x4d   :  { %1648 = vmatprep.subr.bf16.mxu1 %v1811_v5  ;;  %v1819_v13 = vld [vmem:[#allocation7 + $0xd8] sm:$0xff]   ;;  %v1823_v17 = vld [vmem:[#allocation7 + $0xe0] sm:$0xff]   ;;  %v1826_v20 = vld [vmem:[#allocation7 + $0x68] sm:$0xff]  }
  0x4e   :  { %v1820_v14 = vld [vmem:[#allocation7 + $0x18] sm:$0xff]   ;;  %v1824_v18 = vld [vmem:[#allocation7 + $0x20] sm:$0xff]   ;;  %v1827_v21 = vld [vmem:[#allocation7 + $0xe8] sm:$0xff]  }
  0x4f   :  { %1627 = vmatpush3.bf16.msra.mxu0 %v1812_v6  ;;  %v1821_v15 = vld [vmem:[#allocation7 + $0x98] sm:$0xff]   ;;  %v1825_v19 = vld [vmem:[#allocation7 + $0xa0] sm:$0xff]   ;;  %v1828_v22 = vld [vmem:[#allocation7 + $0x28] sm:$0xff]  }
  0x50   :  { %1649 = vmatpush3.bf16.msra.mxu1 %v1813_v7  ;;  %1628 = vmatprep.subr.bf16.mxu0 %v1814_v8  ;;  %v1829_v23 = vld [vmem:[#allocation7 + $0xa8] sm:$0xff]   ;;  %v1830_v24 = vld [vmem:[#allocation7 + $0x70] sm:$0xff]   ;;  %v1834_v28 = vld [vmem:[#allocation7 + $0x78] sm:$0xff]  }
  0x51   :  { %1650 = vmatprep.subr.bf16.mxu1 %v1815_v9  ;;  %v1831_v25 = vld [vmem:[#allocation7 + $0xf0] sm:$0xff]   ;;  %v1835_v29 = vld [vmem:[#allocation7 + $0xf8] sm:$0xff]   ;;  %v81_v32 = vld [vmem:[#allocation3 + $0x8] sm:$0xff] }
  0x52   :  { %v1832_v26 = vld [vmem:[#allocation7 + $0x30] sm:$0xff]   ;;  %v1836_v30 = vld [vmem:[#allocation7 + $0x38] sm:$0xff]   ;;  %v80_v34 = vld [vmem:[#allocation3] sm:$0xff]  ;;  %v89_v35 = vpack.c.bf16 %v81_v32, %v81_v32 }
  0x53   :  { %1629 = vmatpush3.bf16.msra.mxu0 %v1816_v10  ;;  %v1833_v27 = vld [vmem:[#allocation7 + $0xb0] sm:$0xff]   ;;  %v1837_v31 = vld [vmem:[#allocation7 + $0xb8] sm:$0xff]   ;;  %v88_v37 = vpack.c.bf16 %v80_v34, %v80_v34  ;;  %v1838_v40 = vld [vmem:[#allocation7 + $0x140] sm:$0xff]  }
  0x54   :  { %1651 = vmatpush3.bf16.msra.mxu1 %v1817_v11  ;;  %1630 = vmatprep.subr.bf16.mxu0 %v1818_v12  ;;  %v83_v33 = vld [vmem:[#allocation3 + $0x18] sm:$0xff]  ;;  %v82_v38 = vld [vmem:[#allocation3 + $0x10] sm:$0xff]  ;;  %v1839_v41 = vld [vmem:[#allocation7 + $0x1c0] sm:$0xff]  }
  0x55   :  { %1652 = vmatprep.subr.bf16.mxu1 %v1819_v13  ;;  %v91_v36 = vpack.c.bf16 %v83_v33, %v83_v33  ;;  %v90_v39 = vpack.c.bf16 %v82_v38, %v82_v38  ;;  %657 = vmatprep.mubr.bf16.mxu0 %v89_v35  ;;  %v1840_v42 = vld [vmem:[#allocation7 + $0x100] sm:$0xff]   ;;  %v1842_v44 = vld [vmem:[#allocation7 + $0x148] sm:$0xff]   ;;  %v1846_v48 = vld [vmem:[#allocation7 + $0x150] sm:$0xff]  }
  0x56   :  { %v1841_v43 = vld [vmem:[#allocation7 + $0x180] sm:$0xff]   ;;  %v1843_v45 = vld [vmem:[#allocation7 + $0x1c8] sm:$0xff]   ;;  %v1847_v49 = vld [vmem:[#allocation7 + $0x1d0] sm:$0xff]  }
  0x57   :  { %1631 = vmatpush3.bf16.msra.mxu0 %v1820_v14  ;;  %697 = vmatprep.mubr.bf16.mxu1 %v91_v36  ;;  %v1844_v46 = vld [vmem:[#allocation7 + $0x108] sm:$0xff]   ;;  %v1848_v50 = vld [vmem:[#allocation7 + $0x110] sm:$0xff]   ;;  %v1850_v52 = vld [vmem:[#allocation7 + $0x158] sm:$0xff]  }
  0x58   :  { %1653 = vmatpush3.bf16.msra.mxu1 %v1821_v15  ;;  %1632 = vmatprep.subr.bf16.mxu0 %v1822_v16  ;;  %v1845_v47 = vld [vmem:[#allocation7 + $0x188] sm:$0xff]   ;;  %v1849_v51 = vld [vmem:[#allocation7 + $0x190] sm:$0xff]   ;;  %v1851_v53 = vld [vmem:[#allocation7 + $0x1d8] sm:$0xff]  }
  0x59   :  { %1654 = vmatprep.subr.bf16.mxu1 %v1823_v17  ;;  %v1852_v54 = vld [vmem:[#allocation7 + $0x118] sm:$0xff]   ;;  %v1854_v56 = vld [vmem:[#allocation7 + $0x160] sm:$0xff]   ;;  %v1858_v60 = vld [vmem:[#allocation7 + $0x168] sm:$0xff]  }
  0x5a   :  { %v1853_v55 = vld [vmem:[#allocation7 + $0x198] sm:$0xff]   ;;  %v1855_v57 = vld [vmem:[#allocation7 + $0x1e0] sm:$0xff]   ;;  %v1859_v61 = vld [vmem:[#allocation7 + $0x1e8] sm:$0xff]  }
  0x5b   :  { %1633 = vmatpush3.bf16.msra.mxu0 %v1824_v18  ;;  %v1856_v58 = vld [vmem:[#allocation7 + $0x120] sm:$0xff]   ;;  %v1860_v62 = vld [vmem:[#allocation7 + $0x128] sm:$0xff]   ;;  %v1862_v0 = vld [vmem:[#allocation7 + $0x170] sm:$0xff]  }
  0x5c   :  { %1655 = vmatpush3.bf16.msra.mxu1 %v1825_v19  ;;  %1634 = vmatprep.subr.bf16.mxu0 %v1826_v20  ;;  %v1857_v59 = vld [vmem:[#allocation7 + $0x1a0] sm:$0xff]   ;;  %v1861_v63 = vld [vmem:[#allocation7 + $0x1a8] sm:$0xff]   ;;  %v1863_v1 = vld [vmem:[#allocation7 + $0x1f0] sm:$0xff]  }
  0x5d   :  { %1656 = vmatprep.subr.bf16.mxu1 %v1827_v21  ;;  %v1864_v2 = vld [vmem:[#allocation7 + $0x130] sm:$0xff]   ;;  %v1866_v4 = vld [vmem:[#allocation7 + $0x178] sm:$0xff]   ;;  %v85_v8 = vld [vmem:[#allocation3 + $0x28] sm:$0xff] }
  0x5e   :  { %v1865_v3 = vld [vmem:[#allocation7 + $0x1b0] sm:$0xff]   ;;  %v1867_v5 = vld [vmem:[#allocation7 + $0x1f8] sm:$0xff]   ;;  %v93_v10 = vpack.c.bf16 %v85_v8, %v85_v8  ;;  %v84_v12 = vld [vmem:[#allocation3 + $0x20] sm:$0xff] }
  0x5f   :  { %1635 = vmatpush3.bf16.msra.mxu0 %v1828_v22  ;;  %v1868_v6 = vld [vmem:[#allocation7 + $0x138] sm:$0xff]   ;;  %v86_v13 = vld [vmem:[#allocation3 + $0x30] sm:$0xff]  ;;  %v92_v14 = vpack.c.bf16 %v84_v12, %v84_v12  ;;  %v1870_v16 = vld [vmem:[#allocation8 + $0x40] sm:$0xff]  }
  0x60   :  { %1657 = vmatpush3.bf16.msra.mxu1 %v1829_v23  ;;  %1636 = vmatprep.subr.bf16.mxu0 %v1830_v24  ;;  %v1869_v7 = vld [vmem:[#allocation7 + $0x1b8] sm:$0xff]   ;;  %v94_v15 = vpack.c.bf16 %v86_v13, %v86_v13  ;;  %v1871_v17 = vld [vmem:[#allocation8 + $0xc0] sm:$0xff]   ;;  %v1874_v20 = vld [vmem:[#allocation8 + $0x48] sm:$0xff]  }
  0x61   :  { %1658 = vmatprep.subr.bf16.mxu1 %v1831_v25  ;;  %v87_v9 = vld [vmem:[#allocation3 + $0x38] sm:$0xff]  ;;  %v1872_v18 = vld [vmem:[#allocation8] sm:$0xff]   ;;  %v1875_v21 = vld [vmem:[#allocation8 + $0xc8] sm:$0xff]  }
  0x62   :  { %v95_v11 = vpack.c.bf16 %v87_v9, %v87_v9  ;;  %v1873_v19 = vld [vmem:[#allocation8 + $0x80] sm:$0xff]   ;;  %v1876_v22 = vld [vmem:[#allocation8 + $0x8] sm:$0xff]   ;;  %v1878_v24 = vld [vmem:[#allocation8 + $0x50] sm:$0xff]  }
  0x63   :  { %1637 = vmatpush3.bf16.msra.mxu0 %v1832_v26  ;;  %v1877_v23 = vld [vmem:[#allocation8 + $0x88] sm:$0xff]   ;;  %v1879_v25 = vld [vmem:[#allocation8 + $0xd0] sm:$0xff]   ;;  %v1886_v32 = vld [vmem:[#allocation8 + $0x60] sm:$0xff]  }
  0x64   :  { %1659 = vmatpush3.bf16.msra.mxu1 %v1833_v27  ;;  %1638 = vmatprep.subr.bf16.mxu0 %v1834_v28  ;;  %v1880_v26 = vld [vmem:[#allocation8 + $0x10] sm:$0xff]   ;;  %v1882_v28 = vld [vmem:[#allocation8 + $0x58] sm:$0xff]   ;;  %v1887_v33 = vld [vmem:[#allocation8 + $0xe0] sm:$0xff]  }
  0x65   :  { %1660 = vmatprep.subr.bf16.mxu1 %v1835_v29  ;;  %v1881_v27 = vld [vmem:[#allocation8 + $0x90] sm:$0xff]   ;;  %v1883_v29 = vld [vmem:[#allocation8 + $0xd8] sm:$0xff]   ;;  %v1888_v34 = vld [vmem:[#allocation8 + $0x20] sm:$0xff]  }
  0x66   :  { %v1889_v35 = vld [vmem:[#allocation8 + $0xa0] sm:$0xff]   ;;  %v1890_v36 = vld [vmem:[#allocation8 + $0x68] sm:$0xff]  }
  0x67   :  { %1639 = vmatpush3.bf16.msra.mxu0 %v1836_v30  ;;  %v1884_v30 = vld [vmem:[#allocation8 + $0x18] sm:$0xff]   ;;  %v1892_v38 = vld [vmem:[#allocation8 + $0x28] sm:$0xff]   ;;  %v1918_v8 = vld [vmem:[#allocation8 + $0x160] sm:$0xff]  }
  0x68   :  { %1661 = vmatpush3.bf16.msra.mxu1 %v1837_v31  ;;  %1668 = vmatprep.subr.bf16.mxu0 %v1838_v40  ;;  %v1885_v31 = vld [vmem:[#allocation8 + $0x98] sm:$0xff]   ;;  %v1894_v40 = vld [vmem:[#allocation8 + $0x70] sm:$0xff]   ;;  %v1919_v9 = vld [vmem:[#allocation8 + $0x1e0] sm:$0xff]  }
  0x69   :  { %1690 = vmatprep.subr.bf16.mxu1 %v1839_v41  ;;  %v1895_v41 = vld [vmem:[#allocation8 + $0xf0] sm:$0xff]   ;;  %v1922_v12 = vld [vmem:[#allocation8 + $0x168] sm:$0xff]  }
  0x6a   :  { %658 = vmatmul.mubr.bf16.vlgmr.msra.gmra.mrb[0].mxu0 %v88_v37  ;;  %v1891_v37 = vld [vmem:[#allocation8 + $0xe8] sm:$0xff]  }
  0x6b   :  { %698 = vmatmul.mubr.bf16.vlgmr.msra.gmra.mrb[0].mxu1 %v90_v39  ;;  %1669 = vmatpush3.bf16.msra.mxu0 %v1840_v42  ;;  %v1893_v39 = vld [vmem:[#allocation8 + $0xa8] sm:$0xff]   ;;  %v1896_v42 = vld [vmem:[#allocation8 + $0x30] sm:$0xff]  }
  0x6c   :  { %1691 = vmatpush3.bf16.msra.mxu1 %v1841_v43  ;;  %1670 = vmatprep.subr.bf16.mxu0 %v1842_v44  ;;  %v1897_v43 = vld [vmem:[#allocation8 + $0xb0] sm:$0xff]   ;;  %v1898_v44 = vld [vmem:[#allocation8 + $0x78] sm:$0xff]   ;;  %v1923_v13 = vld [vmem:[#allocation8 + $0x1e8] sm:$0xff]  }
  0x6d   :  { %1692 = vmatprep.subr.bf16.mxu1 %v1843_v45  ;;  %737 = vmatprep.mubr.bf16.mxu0 %v93_v10  ;;  %v1899_v45 = vld [vmem:[#allocation8 + $0xf8] sm:$0xff]   ;;  %v1920_v10 = vld [vmem:[#allocation8 + $0x120] sm:$0xff]  }
  0x6e   :  { %777 = vmatprep.mubr.bf16.mxu1 %v95_v11  ;;  %v1921_v11 = vld [vmem:[#allocation8 + $0x1a0] sm:$0xff]  }
  0x6f   :  { %1671 = vmatpush3.bf16.msra.mxu0 %v1844_v46  ;;  %v1900_v46 = vld [vmem:[#allocation8 + $0x38] sm:$0xff]  }
  0x70   :  { %1693 = vmatpush3.bf16.msra.mxu1 %v1845_v47  ;;  %1672 = vmatprep.subr.bf16.mxu0 %v1846_v48  ;;  %v1901_v47 = vld [vmem:[#allocation8 + $0xb8] sm:$0xff]   ;;  %v97_v48 = vld [vmem:[#allocation5 + $0x8] sm:$0xff] }
  0x71   :  { %1694 = vmatprep.subr.bf16.mxu1 %v1847_v49  ;;  %v105_v49 = vpack.c.bf16 %v97_v48, %v97_v48 }
  0x73   :  { %1673 = vmatpush3.bf16.msra.mxu0 %v1848_v50  ;;  %v99_v50 = vld [vmem:[#allocation5 + $0x18] sm:$0xff] }
  0x74   :  { %1695 = vmatpush3.bf16.msra.mxu1 %v1849_v51  ;;  %1674 = vmatprep.subr.bf16.mxu0 %v1850_v52  ;;  %v96_v51 = vld [vmem:[#allocation5] sm:$0xff]  ;;  %v98_v52 = vld [vmem:[#allocation5 + $0x10] sm:$0xff] }
  0x75   :  { %1696 = vmatprep.subr.bf16.mxu1 %v1851_v53  ;;  %v107_v53 = vpack.c.bf16 %v99_v50, %v99_v50 }
  0x77   :  { %1675 = vmatpush3.bf16.msra.mxu0 %v1852_v54  ;;  %v104_v54 = vpack.c.bf16 %v96_v51, %v96_v51 }
  0x78   :  { %1697 = vmatpush3.bf16.msra.mxu1 %v1853_v55  ;;  %1676 = vmatprep.subr.bf16.mxu0 %v1854_v56  ;;  %v106_v55 = vpack.c.bf16 %v98_v52, %v98_v52  ;;  %v1902_v56 = vld [vmem:[#allocation8 + $0x140] sm:$0xff]  }
  0x79   :  { %1698 = vmatprep.subr.bf16.mxu1 %v1855_v57  ;;  %v1903_v57 = vld [vmem:[#allocation8 + $0x1c0] sm:$0xff]  }
  0x7b   :  { %1677 = vmatpush3.bf16.msra.mxu0 %v1856_v58  ;;  %v1904_v58 = vld [vmem:[#allocation8 + $0x100] sm:$0xff]  }
  0x7c   :  { %1699 = vmatpush3.bf16.msra.mxu1 %v1857_v59  ;;  %1678 = vmatprep.subr.bf16.mxu0 %v1858_v60  ;;  %v1905_v59 = vld [vmem:[#allocation8 + $0x180] sm:$0xff]   ;;  %v1906_v60 = vld [vmem:[#allocation8 + $0x148] sm:$0xff]  }
  0x7d   :  { %1700 = vmatprep.subr.bf16.mxu1 %v1859_v61  ;;  %v1907_v61 = vld [vmem:[#allocation8 + $0x1c8] sm:$0xff]  }
  0x7f   :  { %1679 = vmatpush3.bf16.msra.mxu0 %v1860_v62  ;;  %v1908_v62 = vld [vmem:[#allocation8 + $0x108] sm:$0xff]  }
  0x80   :  { %1701 = vmatpush3.bf16.msra.mxu1 %v1861_v63  ;;  %1680 = vmatprep.subr.bf16.mxu0 %v1862_v0  ;;  %v1909_v63 = vld [vmem:[#allocation8 + $0x188] sm:$0xff]   ;;  %v1910_v0 = vld [vmem:[#allocation8 + $0x150] sm:$0xff]  }
  0x81   :  { %1702 = vmatprep.subr.bf16.mxu1 %v1863_v1  ;;  %v1911_v1 = vld [vmem:[#allocation8 + $0x1d0] sm:$0xff]  }
  0x83   :  { %1681 = vmatpush3.bf16.msra.mxu0 %v1864_v2  ;;  %v1912_v2 = vld [vmem:[#allocation8 + $0x110] sm:$0xff]  }
  0x84   :  { %1703 = vmatpush3.bf16.msra.mxu1 %v1865_v3  ;;  %1682 = vmatprep.subr.bf16.mxu0 %v1866_v4  ;;  %v1913_v3 = vld [vmem:[#allocation8 + $0x190] sm:$0xff]   ;;  %v1914_v4 = vld [vmem:[#allocation8 + $0x158] sm:$0xff]  }
  0x85   :  { %1704 = vmatprep.subr.bf16.mxu1 %v1867_v5  ;;  %v1915_v5 = vld [vmem:[#allocation8 + $0x1d8] sm:$0xff]  }
  0x87   :  { %1683 = vmatpush3.bf16.msra.mxu0 %v1868_v6  ;;  %v1916_v6 = vld [vmem:[#allocation8 + $0x118] sm:$0xff]  }
  0x88   :  { %1705 = vmatpush3.bf16.msra.mxu1 %v1869_v7  ;;  %1712 = vmatprep.subr.bf16.mxu0 %v1870_v16  ;;  %v1917_v7 = vld [vmem:[#allocation8 + $0x198] sm:$0xff]   ;;  %v1926_v16 = vld [vmem:[#allocation8 + $0x170] sm:$0xff]  }
  0x89   :  { %1734 = vmatprep.subr.bf16.mxu1 %v1871_v17  ;;  %v1927_v17 = vld [vmem:[#allocation8 + $0x1f0] sm:$0xff]  }
  0x8a   :  { %738 = vmatmul.mubr.bf16.vlgmr.msra.gmra.mrb[4].mxu0 %v92_v14  ;;  %v1924_v14 = vld [vmem:[#allocation8 + $0x128] sm:$0xff]  }
  0x8b   :  { %778 = vmatmul.mubr.bf16.vlgmr.msra.gmra.mrb[4].mxu1 %v94_v15  ;;  %1713 = vmatpush3.bf16.msra.mxu0 %v1872_v18  ;;  %v1925_v15 = vld [vmem:[#allocation8 + $0x1a8] sm:$0xff]   ;;  %v1928_v18 = vld [vmem:[#allocation8 + $0x130] sm:$0xff]  }
  0x8c   :  { %1735 = vmatpush3.bf16.msra.mxu1 %v1873_v19  ;;  %1714 = vmatprep.subr.bf16.mxu0 %v1874_v20  ;;  %v1929_v19 = vld [vmem:[#allocation8 + $0x1b0] sm:$0xff]   ;;  %v1930_v20 = vld [vmem:[#allocation8 + $0x178] sm:$0xff]  }
  0x8d   :  { %1736 = vmatprep.subr.bf16.mxu1 %v1875_v21  ;;  %1332 = vmatprep.mubr.bf16.mxu0 %v105_v49  ;;  %v1931_v21 = vld [vmem:[#allocation8 + $0x1f8] sm:$0xff]  }
  0x8e   :  { %1372 = vmatprep.mubr.bf16.mxu1 %v107_v53 }
  0x8f   :  { %1715 = vmatpush3.bf16.msra.mxu0 %v1876_v22  ;;  %v1932_v22 = vld [vmem:[#allocation8 + $0x138] sm:$0xff]  }
  0x90   :  { %1737 = vmatpush3.bf16.msra.mxu1 %v1877_v23  ;;  %1716 = vmatprep.subr.bf16.mxu0 %v1878_v24  ;;  %v1933_v23 = vld [vmem:[#allocation8 + $0x1b8] sm:$0xff]   ;;  %v101_v24 = vld [vmem:[#allocation5 + $0x28] sm:$0xff] }
  0x91   :  { %1738 = vmatprep.subr.bf16.mxu1 %v1879_v25  ;;  %v103_v25 = vld [vmem:[#allocation5 + $0x38] sm:$0xff] }
  0x93   :  { %1717 = vmatpush3.bf16.msra.mxu0 %v1880_v26  ;;  %v100_v26 = vld [vmem:[#allocation5 + $0x20] sm:$0xff] }
  0x94   :  { %1739 = vmatpush3.bf16.msra.mxu1 %v1881_v27  ;;  %1718 = vmatprep.subr.bf16.mxu0 %v1882_v28  ;;  %v109_v27 = vpack.c.bf16 %v101_v24, %v101_v24  ;;  %v111_v28 = vpack.c.bf16 %v103_v25, %v103_v25 }
  0x95   :  { %1740 = vmatprep.subr.bf16.mxu1 %v1883_v29  ;;  %v108_v29 = vpack.c.bf16 %v100_v26, %v100_v26 }
  0x97   :  { %1719 = vmatpush3.bf16.msra.mxu0 %v1884_v30  ;;  %v102_v30 = vld [vmem:[#allocation5 + $0x30] sm:$0xff] }
  0x98   :  { %1741 = vmatpush3.bf16.msra.mxu1 %v1885_v31  ;;  %1720 = vmatprep.subr.bf16.mxu0 %v1886_v32  ;;  %v110_v31 = vpack.c.bf16 %v102_v30, %v102_v30 }
  0x99   :  { %1742 = vmatprep.subr.bf16.mxu1 %v1887_v33 }
  0x9b   :  { %1721 = vmatpush3.bf16.msra.mxu0 %v1888_v34 }
  0x9c   :  { %1743 = vmatpush3.bf16.msra.mxu1 %v1889_v35  ;;  %1722 = vmatprep.subr.bf16.mxu0 %v1890_v36 }
  0x9d   :  { %1744 = vmatprep.subr.bf16.mxu1 %v1891_v37 }
  0x9f   :  { %1723 = vmatpush3.bf16.msra.mxu0 %v1892_v38 }
  0xa0   :  { %1745 = vmatpush3.bf16.msra.mxu1 %v1893_v39  ;;  %1724 = vmatprep.subr.bf16.mxu0 %v1894_v40 }
  0xa1   :  { %1746 = vmatprep.subr.bf16.mxu1 %v1895_v41 }
  0xa3   :  { %1725 = vmatpush3.bf16.msra.mxu0 %v1896_v42 }
  0xa4   :  { %1747 = vmatpush3.bf16.msra.mxu1 %v1897_v43  ;;  %1726 = vmatprep.subr.bf16.mxu0 %v1898_v44 }
  0xa5   :  { %1748 = vmatprep.subr.bf16.mxu1 %v1899_v45 }
  0xa7   :  { %1727 = vmatpush3.bf16.msra.mxu0 %v1900_v46 }
  0xa8   :  { %1749 = vmatpush3.bf16.msra.mxu1 %v1901_v47  ;;  %1756 = vmatprep.subr.bf16.mxu0 %v1902_v56 }
  0xa9   :  { %1778 = vmatprep.subr.bf16.mxu1 %v1903_v57 }
  0xaa   :  { %1333 = vmatmul.mubr.bf16.vlgmr.msra.gmra.mrb[8].mxu0 %v104_v54 }
  0xab   :  { %1373 = vmatmul.mubr.bf16.vlgmr.msra.gmra.mrb[8].mxu1 %v106_v55  ;;  %1757 = vmatpush3.bf16.msra.mxu0 %v1904_v58 }
  0xac   :  { %1779 = vmatpush3.bf16.msra.mxu1 %v1905_v59  ;;  %1758 = vmatprep.subr.bf16.mxu0 %v1906_v60 }
  0xad   :  { %1780 = vmatprep.subr.bf16.mxu1 %v1907_v61  ;;  %1412 = vmatprep.mubr.bf16.mxu0 %v109_v27 }
  0xae   :  { %1452 = vmatprep.mubr.bf16.mxu1 %v111_v28 }
  0xaf   :  { %1759 = vmatpush3.bf16.msra.mxu0 %v1908_v62 }
  0xb0   :  { %1781 = vmatpush3.bf16.msra.mxu1 %v1909_v63  ;;  %1760 = vmatprep.subr.bf16.mxu0 %v1910_v0 }
  0xb1   :  { %1782 = vmatprep.subr.bf16.mxu1 %v1911_v1 }
  0xb3   :  { %1761 = vmatpush3.bf16.msra.mxu0 %v1912_v2 }
  0xb4   :  { %1783 = vmatpush3.bf16.msra.mxu1 %v1913_v3  ;;  %1762 = vmatprep.subr.bf16.mxu0 %v1914_v4 }
  0xb5   :  { %1784 = vmatprep.subr.bf16.mxu1 %v1915_v5 }
  0xb7   :  { %1763 = vmatpush3.bf16.msra.mxu0 %v1916_v6 }
  0xb8   :  { %1785 = vmatpush3.bf16.msra.mxu1 %v1917_v7  ;;  %1764 = vmatprep.subr.bf16.mxu0 %v1918_v8 }
  0xb9   :  { %1786 = vmatprep.subr.bf16.mxu1 %v1919_v9 }
  0xbb   :  { %1765 = vmatpush3.bf16.msra.mxu0 %v1920_v10 }
  0xbc   :  { %1787 = vmatpush3.bf16.msra.mxu1 %v1921_v11  ;;  %1766 = vmatprep.subr.bf16.mxu0 %v1922_v12 }
  0xbd   :  { %1788 = vmatprep.subr.bf16.mxu1 %v1923_v13 }
  0xbf   :  { %1767 = vmatpush3.bf16.msra.mxu0 %v1924_v14  ;;  %v1622_v14 = vld [vmem:[%s2130_s4] ss:$0 sm:$0xff] }
  0xc0   :  { %1789 = vmatpush3.bf16.msra.mxu1 %v1925_v15  ;;  %1768 = vmatprep.subr.bf16.mxu0 %v1926_v16 }
  0xc1   :  { %1790 = vmatprep.subr.bf16.mxu1 %v1927_v17  ;;  %v1623_v17 = vld [vmem:[%s2131_s5] ss:$0 sm:$0xff] }
  0xc3   :  { %1769 = vmatpush3.bf16.msra.mxu0 %v1928_v18 }
  0xc4   :  { %1791 = vmatpush3.bf16.msra.mxu1 %v1929_v19  ;;  %1770 = vmatprep.subr.bf16.mxu0 %v1930_v20 }
  0xc5   :  { %1792 = vmatprep.subr.bf16.mxu1 %v1931_v21 }
  0xc7   :  { %1771 = vmatpush3.bf16.msra.mxu0 %v1932_v22 }
  0xc8   :  { %1793 = vmatpush3.bf16.msra.mxu1 %v1933_v23 }
  0xca   :  { %1413 = vmatmul.mubr.bf16.vlgmr.msra.gmra.mrb[12].mxu0 %v108_v29 }
  0xcb   :  { %1453 = vmatmul.mubr.bf16.vlgmr.msra.gmra.mrb[12].mxu1 %v110_v31 }
 0x13d   :  { %v1640_v32 = vpop.f32.mrb[0].mxu0 }
 0x13e   :  { %v1662_v33 = vpop.f32.mrb[0].mxu1  ;;  %v1641_v34 = vpop.f32.mrb[1].mxu0 }
 0x13f   :  { %v1663_v35 = vpop.f32.mrb[1].mxu1  ;;  %v1642_v36 = vadd.f32 %v1641_v34, %v1640_v32  ;;  %v1643_v38 = vpop.f32.mrb[2].mxu0 }
 0x140   :  { %v1664_v37 = vadd.f32 %v1663_v35, %v1662_v33  ;;  %v1665_v39 = vpop.f32.mrb[2].mxu1  ;;  %v1644_v40 = vpop.f32.mrb[3].mxu0 }
 0x141   :  { %v1666_v41 = vpop.f32.mrb[3].mxu1 }
 0x142   :  { %v700_v42 = vadd.f32 %v1664_v37, %v1642_v36 }
 0x15d   :  { %v1684_v43 = vpop.f32.mrb[4].mxu0 }
 0x15e   :  { %v1706_v44 = vpop.f32.mrb[4].mxu1  ;;  %v1685_v45 = vpop.f32.mrb[5].mxu0 }
 0x15f   :  { %v1686_v46 = vadd.f32 %v1685_v45, %v1684_v43  ;;  %v1707_v47 = vpop.f32.mrb[5].mxu1  ;;  %v1687_v48 = vpop.f32.mrb[6].mxu0 }
 0x160   :  { %v1708_v49 = vadd.f32 %v1707_v47, %v1706_v44  ;;  %v1709_v50 = vpop.f32.mrb[6].mxu1  ;;  %v1688_v51 = vpop.f32.mrb[7].mxu0 }
 0x161   :  { %v740_v52 = vadd.f32 %v1686_v46, %v700_v42  ;;  %v1710_v53 = vpop.f32.mrb[7].mxu1 }
 0x163   :  { %v780_v54 = vadd.f32 %v1708_v49, %v740_v52 }
 0x17d   :  { %v1728_v55 = vpop.f32.mrb[8].mxu0 }
 0x17e   :  { %v1750_v56 = vpop.f32.mrb[8].mxu1  ;;  %v1729_v57 = vpop.f32.mrb[9].mxu0 }
 0x17f   :  { %v1730_v58 = vadd.f32 %v1729_v57, %v1728_v55  ;;  %v1751_v59 = vpop.f32.mrb[9].mxu1  ;;  %v1731_v60 = vpop.f32.mrb[10].mxu0 }
 0x180   :  { %v1752_v61 = vadd.f32 %v1751_v59, %v1750_v56  ;;  %v1753_v62 = vpop.f32.mrb[10].mxu1  ;;  %v1732_v63 = vpop.f32.mrb[11].mxu0 }
 0x181   :  { %v1754_v0 = vpop.f32.mrb[11].mxu1 }
 0x182   :  { %v1375_v1 = vadd.f32 %v1752_v61, %v1730_v58 }
 0x19d   :  { %v1772_v2 = vpop.f32.mrb[12].mxu0 }
 0x19e   :  { %v1794_v3 = vpop.f32.mrb[12].mxu1  ;;  %v1773_v4 = vpop.f32.mrb[13].mxu0 }
 0x19f   :  { %v1795_v5 = vpop.f32.mrb[13].mxu1  ;;  %v1774_v6 = vadd.f32 %v1773_v4, %v1772_v2  ;;  %v1775_v8 = vpop.f32.mrb[14].mxu0 }
 0x1a0   :  { %v1796_v7 = vadd.f32 %v1795_v5, %v1794_v3  ;;  %v1797_v9 = vpop.f32.mrb[14].mxu1  ;;  %v1776_v10 = vpop.f32.mrb[15].mxu0 }
 0x1a1   :  { %v1798_v11 = vpop.f32.mrb[15].mxu1  ;;  %v1415_v12 = vadd.f32 %v1774_v6, %v1375_v1 }
 0x1a3   :  { %v1455_v13 = vadd.f32 %v1796_v7, %v1415_v12 }
 0x1a5   :  { %v1460_v15 = vadd.f32 %v1455_v13, %v780_v54 }
 0x1a7   :  { %v1473_v16 = vadd.f32 %v1622_v14, %v1460_v15 }
 0x1a9   :  { %v1474_v18 = vmax.f32 %v1473_v16, 0.0 }
 0x1ab   :  { %v1482_v19 = vmul.f32 %v1623_v17, %v1474_v18 }
 0x1ad   :  { %1483 = vadd.xlane.f32.xlu0 %v1482_v19 }
 0x23a   :  { %v1484_v20 = vpop.xlane.xlu0 %1483 }
 0x23b   :  { %1486 = vst.msk [vmem:[%s2132_s6] sm:$0xff] %vm1485_vm0, %v1484_v20 }
 0x23c   :  { %1491 = vsyncpa [#allocation4], 1 }
 0x23d   :  { %1492 = vsyncpa [#allocation6], 1 }
 0x23e   :  { %1493 = vsyncpa [#allocation9], 1 }

</bundles_post_ra>
